<compile_context>
chip_gen: v5e
topology: v5e:2x2
jax: 0.10.0
libtpu: 0.0.40
codegen_flags: <defaults>
</compile_context>

<pallas_src>
import functools

import jax
import jax.numpy as jnp
from jax.experimental import pallas as pl
from jax.experimental.pallas import tpu as pltpu


def _bce_row_sums_kernel(pred_ref, targ_ref, base_ref, pos_ref, base_acc, pos_acc,
                         *, n_cb, cb, M, needs_col_mask):
    # pred_ref, targ_ref : (rb, cb) tile of logits / targets
    # base_ref, pos_ref  : (rb, 1)  per-row partial sums (written at last k)
    # base_acc, pos_acc  : (rb, 1)  f32 VMEM running accumulators
    k = pl.program_id(2)                      # reduction axis (innermost)

    @pl.when(k == 0)
    def _():
        base_acc[...] = jnp.zeros_like(base_acc)
        pos_acc[...] = jnp.zeros_like(pos_acc)

    x = pred_ref[...].astype(jnp.float32)
    t = targ_ref[...].astype(jnp.float32)

    negx = -x
    # stable softplus(-x) = relu(-x) + log1p(exp(-|x|));  -|x| = min(x, -x)
    sp = jnp.maximum(negx, 0.0) + jnp.log1p(jnp.exp(jnp.minimum(x, negx)))
    base = (x - t * x) + sp                   # pos_weight-independent part
    pos = (t * t) * sp                        # multiplied by (pw - 1) outside

    if needs_col_mask:
        # Zero contributions from padded / out-of-range columns.  Rows need no
        # mask: out-of-bounds output rows are dropped on writeback.
        p = pl.program_id(1)
        col0 = (p * n_cb + k) * cb
        lane = jax.lax.broadcasted_iota(jnp.int32, x.shape, 1)
        valid = lane < (M - col0)
        base = jnp.where(valid, base, 0.0)
        pos = jnp.where(valid, pos, 0.0)

    base_acc[...] += jnp.sum(base, axis=-1, keepdims=True)
    pos_acc[...] += jnp.sum(pos, axis=-1, keepdims=True)

    @pl.when(k == pl.num_programs(2) - 1)
    def _():
        base_ref[...] = base_acc[...]
        pos_ref[...] = pos_acc[...]


def _round_up(x, m):
    return ((x + m - 1) // m) * m


def _choose_tiling(R, M, itemsize):
    """Pick (rb, cb, n_row_blocks, n_splits, n_cb).

    Targets ~1 MiB per input block (sized by the real itemsize).  Lane dim is a
    multiple of 128, sublane dim a multiple of 8 (capped at 1024 so the
    lane-sparse (rb, 1) buffers stay tiny).  Falls back to the full extent
    (always legal) when the array is smaller than one block along that axis.
    """
    target_elems = max((1 << 20) // itemsize, 8 * 128)     # ~1 MiB per block
    cb = min(_round_up(M, 128), max(128, (target_elems // 8) // 128 * 128))
    if cb >= M:
        cb = M                                              # full extent
    rb = min(_round_up(R, 8), 1024, max(8, (target_elems // cb) // 8 * 8))
    if rb >= R:
        rb = R                                              # full extent

    n_row_blocks = pl.cdiv(R, rb)
    n_col_blocks = pl.cdiv(M, cb)
    # v7x megacore: both leading grid axes are "parallel".  If rows give only
    # one block, split the column blocks into two parallel groups so both
    # TensorCores get work (block size is preserved -> v5e/v6e unaffected).
    n_splits = 2 if (n_row_blocks == 1 and n_col_blocks >= 2) else 1
    n_cb = pl.cdiv(n_col_blocks, n_splits)
    return rb, cb, n_row_blocks, n_splits, n_cb


def bce_with_logistic_loss(predict, target, weight=None, pos_weight=None):
    """JAX/Pallas equivalent of BCEwithLogistic_loss.forward.

    predict, target: (N, C, H, W). weight, pos_weight: optional (C,) arrays.
    Returns a float32 scalar.
    """
    assert predict.shape == target.shape, 'predict & target shape do not match'
    N, C, H, W = predict.shape
    R, M = N * C, H * W

    # NCHW is contiguous as (N*C, H*W): free reshape, no transpose.
    p2 = predict.reshape(R, M)
    t2 = target.reshape(R, M)

    itemsize = max(predict.dtype.itemsize, target.dtype.itemsize)
    rb, cb, n_row_blocks, n_splits, n_cb = _choose_tiling(R, M, itemsize)
    n_col_blocks = pl.cdiv(M, cb)
    needs_col_mask = (n_splits * n_cb * cb) > M          # padded columns exist
    clamp_col_block = (n_splits * n_cb) > n_col_blocks   # fully-padded blocks exist

    def in_index_map(i, p, k):
        j = p * n_cb + k
        if clamp_col_block:
            # Keep the DMA in-bounds for fully-padded blocks; their
            # contribution is zeroed by the in-kernel column mask.
            j = jnp.minimum(j, n_col_blocks - 1)
        return (i, j)

    def out_index_map(i, p, k):
        return (p, i, 0)

    kernel = functools.partial(_bce_row_sums_kernel, n_cb=n_cb, cb=cb, M=M,
                               needs_col_mask=needs_col_mask)

    base, pos = pl.pallas_call(
        kernel,
        out_shape=(
            jax.ShapeDtypeStruct((n_splits, R, 1), jnp.float32),
            jax.ShapeDtypeStruct((n_splits, R, 1), jnp.float32),
        ),
        grid_spec=pltpu.PrefetchScalarGridSpec(
            num_scalar_prefetch=0,
            grid=(n_row_blocks, n_splits, n_cb),
            in_specs=[
                pl.BlockSpec((rb, cb), in_index_map),
                pl.BlockSpec((rb, cb), in_index_map),
            ],
            out_specs=[
                pl.BlockSpec((None, rb, 1), out_index_map),
                pl.BlockSpec((None, rb, 1), out_index_map),
            ],
            scratch_shapes=[
                pltpu.VMEM((rb, 1), jnp.float32),
                pltpu.VMEM((rb, 1), jnp.float32),
            ],
        ),
        compiler_params=pltpu.CompilerParams(
            dimension_semantics=("parallel", "parallel", "arbitrary"),
            vmem_limit_bytes=32 * 1024 * 1024,
        ),
    )(p2, t2)

    base_row = jnp.sum(base, axis=(0, 2))                 # (R,)
    pos_row = jnp.sum(pos, axis=(0, 2))                   # (R,)

    if weight is None:
        w = jnp.ones((C,), jnp.float32)
    else:
        w = jnp.asarray(weight, jnp.float32).reshape(C)
        assert w.shape[0] == C, 'Expect weight shape [{}], get[{}]'.format(C, w.shape[0])
    if pos_weight is None:
        pwm1 = jnp.zeros((C,), jnp.float32)
    else:
        pwm1 = jnp.asarray(pos_weight, jnp.float32).reshape(C) - 1.0

    # row r = n*C + c  ->  channel c = r % C, so tiling over N gives per-row values
    w_rows = jnp.tile(w, N)
    pwm1_rows = jnp.tile(pwm1, N)

    # (1/C) * sum_c w_c * mean_{N,H,W} loss_c  ==  sum(weighted elems) / (N*C*H*W)
    total = jnp.sum(w_rows * (base_row + pwm1_rows * pos_row))
    return (total / (R * M)).astype(jnp.float32)


def _reference(predict, target, weight, pos_weight):
    # pure-JAX reference mirroring the PyTorch module exactly.
    N, C, H, W = predict.shape
    x = predict.astype(jnp.float32)
    t = target.astype(jnp.float32)
    pw = pos_weight.reshape(1, C, 1, 1)
    p_elem = t * (pw - 1.0) + 1.0
    log_w = (p_elem - 1.0) * t + 1.0
    sp = jnp.maximum(-x, 0.0) + jnp.log1p(jnp.exp(-jnp.abs(x)))
    loss = (1.0 - t) * x + log_w * sp
    ch_mean = jnp.mean(loss, axis=(0, 2, 3))               # (C,)
    return jnp.sum(ch_mean * weight) / C


if __name__ == "__main__":
    key = jax.random.PRNGKey(0)
    ks = jax.random.split(key, 16)

    def run_case(shape, with_weights, keys):
        N, C, H, W = shape
        k1, k2, k3, k4 = keys
        predict = jax.random.normal(k1, shape, jnp.float32)
        target = jax.random.bernoulli(k2, 0.5, shape).astype(jnp.float32)
        if with_weights:
            weight = 0.5 + jax.random.uniform(k3, (C,), jnp.float32)
            pos_weight = 1.0 + jax.random.uniform(k4, (C,), jnp.float32)
        else:
            weight, pos_weight = None, None
        out = jax.block_until_ready(
            bce_with_logistic_loss(predict, target, weight=weight, pos_weight=pos_weight))
        w_ref = jnp.ones((C,), jnp.float32) if weight is None else weight
        pw_ref = jnp.ones((C,), jnp.float32) if pos_weight is None else pos_weight
        ref = _reference(predict, target, w_ref, pw_ref)
        assert jnp.allclose(out, ref, rtol=1e-4, atol=1e-5), (shape, out, ref)

    # nominal small case from the module (+ weight=None / pos_weight=None path)
    run_case((2, 4, 16, 16), True, ks[0:4])
    run_case((2, 4, 16, 16), False, ks[0:4])
    # non-divisible dims -> full-extent fallback blocks
    run_case((2, 3, 10, 13), True, ks[4:8])
    # multiple row + column blocks, partial last column block (masked)
    run_case((2, 8, 200, 200), True, ks[8:12])
    # single row block -> 2-way parallel column split, mask + clamped padded block
    run_case((1, 8, 280, 250), True, ks[12:16])

    print("KERNEL_OK")
</pallas_src>

<mosaic_0001>
module attributes {stable_mosaic.version = 11 : i64} {
  func.func @_bce_row_sums_kernel(%arg0: i32, %arg1: i32, %arg2: i32, %arg3: memref<8x256xf32, #tpu.memory_space<vmem>>, %arg4: memref<8x256xf32, #tpu.memory_space<vmem>>, %arg5: memref<1x8x1xf32, #tpu.memory_space<vmem>>, %arg6: memref<1x8x1xf32, #tpu.memory_space<vmem>>, %arg7: memref<8x1xf32, #tpu.memory_space<vmem>>, %arg8: memref<8x1xf32, #tpu.memory_space<vmem>>) attributes {dimension_semantics = [#tpu.dimension_semantics<parallel>, #tpu.dimension_semantics<parallel>, #tpu.dimension_semantics<arbitrary>], iteration_bounds = array<i64: 1, 1, 1>, scalar_prefetch = 0 : i64, scratch_operands = 2 : i64, tpu.core_type = #tpu.core_type<tc>, window_params = [{transform_indices = @transform_0, window_bounds = array<i64: 8, 256>}, {transform_indices = @transform_1, window_bounds = array<i64: 8, 256>}, {transform_indices = @transform_2, window_bounds = array<i64: 1, 8, 1>}, {transform_indices = @transform_3, window_bounds = array<i64: 1, 8, 1>}]} {
    %c0_i32 = arith.constant 0 : i32
    %0 = arith.cmpi eq, %arg2, %c0_i32 : i32
    %1 = arith.extui %0 : i1 to i32
    %c0_i32_0 = arith.constant 0 : i32
    %2 = arith.cmpi ne, %1, %c0_i32_0 : i32
    scf.if %2 {
      %cst_17 = arith.constant 0.000000e+00 : f32
      %31 = vector.broadcast %cst_17 : f32 to vector<8x1xf32>
      %c0_18 = arith.constant 0 : index
      %c0_19 = arith.constant 0 : index
      %32 = vector.load %arg7[%c0_18, %c0_19] : memref<8x1xf32, #tpu.memory_space<vmem>>, vector<8x1xf32>
      tpu.vector_store %arg7[%c0_18, %c0_19], %31 {strides = array<i32>} : memref<8x1xf32, #tpu.memory_space<vmem>>, vector<8x1xf32>,
      %cst_20 = arith.constant 0.000000e+00 : f32
      %33 = vector.broadcast %cst_20 : f32 to vector<8x1xf32>
      %c0_21 = arith.constant 0 : index
      %c0_22 = arith.constant 0 : index
      %34 = vector.load %arg8[%c0_21, %c0_22] : memref<8x1xf32, #tpu.memory_space<vmem>>, vector<8x1xf32>
      tpu.vector_store %arg8[%c0_21, %c0_22], %33 {strides = array<i32>} : memref<8x1xf32, #tpu.memory_space<vmem>>, vector<8x1xf32>,
    } else {
    }
    %c0 = arith.constant 0 : index
    %c0_1 = arith.constant 0 : index
    %3 = vector.load %arg3[%c0, %c0_1] : memref<8x256xf32, #tpu.memory_space<vmem>>, vector<8x256xf32>
    %c0_2 = arith.constant 0 : index
    %c0_3 = arith.constant 0 : index
    %4 = vector.load %arg4[%c0_2, %c0_3] : memref<8x256xf32, #tpu.memory_space<vmem>>, vector<8x256xf32>
    %cst = arith.constant 0.000000e+00 : f32
    %5 = vector.broadcast %cst : f32 to vector<8x256xf32>
    %6 = arith.subf %5, %3 : vector<8x256xf32>
    %cst_4 = arith.constant 0.000000e+00 : f32
    %7 = vector.broadcast %cst_4 : f32 to vector<8x256xf32>
    %8 = arith.maximumf %6, %7 : vector<8x256xf32>
    %9 = arith.minimumf %3, %6 : vector<8x256xf32>
    %10 = math.exp %9 : vector<8x256xf32>
    %11 = math.log1p %10 : vector<8x256xf32>
    %12 = arith.addf %8, %11 : vector<8x256xf32>
    %13 = arith.mulf %4, %3 : vector<8x256xf32>
    %14 = arith.subf %3, %13 : vector<8x256xf32>
    %15 = arith.addf %14, %12 : vector<8x256xf32>
    %16 = arith.mulf %4, %4 : vector<8x256xf32>
    %17 = arith.mulf %16, %12 : vector<8x256xf32>
    %c0_5 = arith.constant 0 : index
    %c0_6 = arith.constant 0 : index
    %18 = vector.load %arg7[%c0_5, %c0_6] : memref<8x1xf32, #tpu.memory_space<vmem>>, vector<8x1xf32>
    %cst_7 = arith.constant dense<0.000000e+00> : vector<8xf32>
    %19 = vector.multi_reduction <add>, %15, %cst_7 [1] : vector<8x256xf32> to vector<8xf32>
    %20 = vector.shape_cast %19 : vector<8xf32> to vector<8x1xf32>
    %21 = arith.addf %18, %20 : vector<8x1xf32>
    %c0_8 = arith.constant 0 : index
    %c0_9 = arith.constant 0 : index
    %22 = vector.load %arg7[%c0_8, %c0_9] : memref<8x1xf32, #tpu.memory_space<vmem>>, vector<8x1xf32>
    tpu.vector_store %arg7[%c0_8, %c0_9], %21 {strides = array<i32>} : memref<8x1xf32, #tpu.memory_space<vmem>>, vector<8x1xf32>,
    %c0_10 = arith.constant 0 : index
    %c0_11 = arith.constant 0 : index
    %23 = vector.load %arg8[%c0_10, %c0_11] : memref<8x1xf32, #tpu.memory_space<vmem>>, vector<8x1xf32>
    %cst_12 = arith.constant dense<0.000000e+00> : vector<8xf32>
    %24 = vector.multi_reduction <add>, %17, %cst_12 [1] : vector<8x256xf32> to vector<8xf32>
    %25 = vector.shape_cast %24 : vector<8xf32> to vector<8x1xf32>
    %26 = arith.addf %23, %25 : vector<8x1xf32>
    %c0_13 = arith.constant 0 : index
    %c0_14 = arith.constant 0 : index
    %27 = vector.load %arg8[%c0_13, %c0_14] : memref<8x1xf32, #tpu.memory_space<vmem>>, vector<8x1xf32>
    tpu.vector_store %arg8[%c0_13, %c0_14], %26 {strides = array<i32>} : memref<8x1xf32, #tpu.memory_space<vmem>>, vector<8x1xf32>,
    %c0_i32_15 = arith.constant 0 : i32
    %28 = arith.cmpi eq, %arg2, %c0_i32_15 : i32
    %29 = arith.extui %28 : i1 to i32
    %c0_i32_16 = arith.constant 0 : i32
    %30 = arith.cmpi ne, %29, %c0_i32_16 : i32
    scf.if %30 {
      %c0_17 = arith.constant 0 : index
      %c0_18 = arith.constant 0 : index
      %31 = vector.load %arg7[%c0_17, %c0_18] : memref<8x1xf32, #tpu.memory_space<vmem>>, vector<8x1xf32>
      %c0_19 = arith.constant 0 : index
      %c0_20 = arith.constant 0 : index
      %c0_21 = arith.constant 0 : index
      %32 = vector.load %arg5[%c0_19, %c0_20, %c0_21] : memref<1x8x1xf32, #tpu.memory_space<vmem>>, vector<1x8x1xf32>
      %33 = vector.shape_cast %32 : vector<1x8x1xf32> to vector<8x1xf32>
      %34 = vector.shape_cast %31 : vector<8x1xf32> to vector<1x8x1xf32>
      tpu.vector_store %arg5[%c0_19, %c0_20, %c0_21], %34 {strides = array<i32>} : memref<1x8x1xf32, #tpu.memory_space<vmem>>, vector<1x8x1xf32>,
      %c0_22 = arith.constant 0 : index
      %c0_23 = arith.constant 0 : index
      %35 = vector.load %arg8[%c0_22, %c0_23] : memref<8x1xf32, #tpu.memory_space<vmem>>, vector<8x1xf32>
      %c0_24 = arith.constant 0 : index
      %c0_25 = arith.constant 0 : index
      %c0_26 = arith.constant 0 : index
      %36 = vector.load %arg6[%c0_24, %c0_25, %c0_26] : memref<1x8x1xf32, #tpu.memory_space<vmem>>, vector<1x8x1xf32>
      %37 = vector.shape_cast %36 : vector<1x8x1xf32> to vector<8x1xf32>
      %38 = vector.shape_cast %35 : vector<8x1xf32> to vector<1x8x1xf32>
      tpu.vector_store %arg6[%c0_24, %c0_25, %c0_26], %38 {strides = array<i32>} : memref<1x8x1xf32, #tpu.memory_space<vmem>>, vector<1x8x1xf32>,
    } else {
    }
    return
  }
  func.func @transform_0(%arg0: i32, %arg1: i32, %arg2: i32) -> (i32, i32) {
    %c1_i32 = arith.constant 1 : i32
    %0 = arith.muli %arg1, %c1_i32 : i32
    %1 = arith.addi %0, %arg2 : i32
    %c0_i32 = arith.constant 0 : i32
    return %arg0, %1 : i32, i32
  }
  func.func @transform_1(%arg0: i32, %arg1: i32, %arg2: i32) -> (i32, i32) {
    %c1_i32 = arith.constant 1 : i32
    %0 = arith.muli %arg1, %c1_i32 : i32
    %1 = arith.addi %0, %arg2 : i32
    %c0_i32 = arith.constant 0 : i32
    return %arg0, %1 : i32, i32
  }
  func.func @transform_2(%arg0: i32, %arg1: i32, %arg2: i32) -> (i32, i32, i32) {
    %c0_i32 = arith.constant 0 : i32
    %c0_i32_0 = arith.constant 0 : i32
    return %arg1, %arg0, %c0_i32 : i32, i32, i32
  }
  func.func @transform_3(%arg0: i32, %arg1: i32, %arg2: i32) -> (i32, i32, i32) {
    %c0_i32 = arith.constant 0 : i32
    %c0_i32_0 = arith.constant 0 : i32
    return %arg1, %arg0, %c0_i32 : i32, i32, i32
  }
}

</mosaic_0001>

<bundles_post_ra>
// kernel: tpu_custom_call.1
= control target key start
LH: loop header
LB: loop body
LE: loop exit
PB: predicated region body
PF: predicated region fallthrough
CT: control target
= control target key end

     0   :  { %9 = vsyncpa [#allocation5], 0  ;;  %s238_s0 = inlined_call_operand.hbm [shape: f32[8,256], index: 0, kind: input, shape index: {}]   ;;  %s239_s1 = inlined_call_operand.hbm [shape: f32[8,256], index: 1, kind: input, shape index: {}]   ;;  %s240_s2 = inlined_call_operand.vmem [shape: f32[1,8,1], index: 2, kind: output, shape index: {0}]   ;;  %s241_s3 = inlined_call_operand.vmem [shape: f32[1,8,1], index: 3, kind: output, shape index: {1}]  }
   0x1   :  { %s20_s14 = sshll.u32 %s238_s0, 4  ;;  %s21_s14 = int_to_ptr.hbm [resolvable:$true] %s20_s14 }
   0x2   :  { %10 = vsyncpa [#allocation7], 0  ;;  %s197_s15 = smov [#allocation4]   ;;  %s35_s19 = sshll.u32 %s239_s1, 4  ;;  %s36_s19 = int_to_ptr.hbm [resolvable:$true] %s35_s19 }
   0x3   :  { %s22_s16 = sshll.u32 %s197_s15, 4  ;;  %s198_s20 = smov [#allocation6]   ;;  %s23_s16 = int_to_ptr.vmem [resolvable:$true] %s22_s16 }
   0x4   :  { %25 = dma.hbm_to_vmem [thread:$0]  %s21_s14, 256, %s23_s16, [#allocation5]  }
   0x5   :  { %s37_s21 = sshll.u32 %s198_s20, 4  ;;  %s38_s21 = int_to_ptr.vmem [resolvable:$true] %s37_s21 }
   0x6   :  { %40 = dma.hbm_to_vmem [thread:$0]  %s36_s19, 256, %s38_s21, [#allocation7]  }
   0x7   :  { %193 = dma.done.wait [#allocation5], 256  }
   0x8   :  { %194 = vsyncadd [#allocation5], 4294967040 }
   0x9   :  { %195 = dma.done.wait [#allocation7], 256  }
   0xa   :  { %196 = vsyncadd [#allocation7], 4294967040  ;;  %v60_v0 = vld [vmem:[#allocation4] sm:$0xff]  ;;  %v61_v1 = vld [vmem:[#allocation4 + $0x8] sm:$0xff]  ;;  %vm57_vm0 = vcmask 7168   ;;  %v199_v8 = vmov 0.0  }
   0xb   :  { %v64_v2 = vsub.f32 0.0, %v60_v0  ;;  %v65_v3 = vsub.f32 0.0, %v61_v1  ;;  %58 = vst.msk [vmem:[#allocation2] sm:$0xff] %vm57_vm0, %v199_v8  ;;  %v62_v15 = vld [vmem:[#allocation6] sm:$0xff]  ;;  %v63_v17 = vld [vmem:[#allocation6 + $0x8] sm:$0xff] }
   0xc   :  { %59 = vst.msk [vmem:[#allocation3] sm:$0xff] %vm57_vm0, %v199_v8  ;;  %v94_v21 = vmul.f32 %v62_v15, %v60_v0  ;;  %v95_v23 = vmul.f32 %v63_v17, %v61_v1  ;;  %v100_v39 = vmul.f32 %v62_v15, %v62_v15  ;;  %v101_v40 = vmul.f32 %v63_v17, %v63_v17 }
   0xd   :  { %v68_v4 = vmin.f32 %v60_v0, %v64_v2  ;;  %v69_v5 = vmin.f32 %v61_v1, %v65_v3  ;;  %v66_v25 = vmax.f32 %v64_v2, 0.0  ;;  %v67_v28 = vmax.f32 %v65_v3, 0.0 }
   0xe   :  { %v96_v31 = vsub.f32 %v60_v0, %v94_v21  ;;  %v97_v33 = vsub.f32 %v61_v1, %v95_v23 }
   0xf   :  { %v70_v6 = vmul.f32 1.442695, %v68_v4  ;;  %v72_v7 = vmul.f32 1.442695, %v69_v5 }
  0x11   :  { %137 = vpow2.f32 %v70_v6 }
  0x12   :  { %139 = vpow2.f32 %v72_v7  ;;  %v104_v45 = vld [vmem:[#allocation2] sm:$0xff] }
  0x13   :  { %v111_v48 = vld [vmem:[#allocation3] sm:$0xff] }
  0x17   :  { %v138_v9 = vpop.eup %137 }
  0x18   :  { %v140_v10 = vpop.eup %139  ;;  %v74_v11 = vadd.f32 1.0, %v138_v9  ;;  %v77_v12 = vmul.f32 -0.5, %v138_v9  ;;  %v80_v18 = vand.u32 2147483647, %v138_v9 }
  0x19   :  { %v83_v13 = vadd.f32 1.0, %v140_v10  ;;  %v86_v14 = vmul.f32 -0.5, %v140_v10  ;;  %v89_v20 = vand.u32 2147483647, %v140_v10 }
  0x1a   :  { %141 = vlog2.f32 %v74_v11  ;;  %v78_v16 = vadd.f32 1.0, %v77_v12  ;;  %vm81_vm1 = vcmp.lt.f32.partialorder %v80_v18, 0.0004427343 }
  0x1b   :  { %143 = vlog2.f32 %v83_v13  ;;  %v87_v19 = vadd.f32 1.0, %v86_v14  ;;  %vm90_vm2 = vcmp.lt.f32.partialorder %v89_v20, 0.0004427343 }
  0x1c   :  { %v79_v22 = vmul.f32 %v138_v9, %v78_v16 }
  0x1d   :  { %v88_v26 = vmul.f32 %v140_v10, %v87_v19 }
  0x20   :  { %v142_v24 = vpop.eup %141 }
  0x21   :  { %v144_v27 = vpop.eup %143  ;;  %v76_v29 = vmul.f32 0.6931472, %v142_v24 }
  0x22   :  { %v85_v30 = vmul.f32 0.6931472, %v144_v27 }
  0x23   :  { %v82_v32 = vsel %vm81_vm1, %v79_v22, %v76_v29 }
  0x24   :  { %v91_v34 = vsel %vm90_vm2, %v88_v26, %v85_v30  ;;  %v92_v35 = vadd.f32 %v82_v32, %v66_v25 }
  0x25   :  { %v93_v36 = vadd.f32 %v91_v34, %v67_v28 }
  0x26   :  { %v98_v37 = vadd.f32 %v96_v31, %v92_v35  ;;  %v102_v42 = vmul.f32 %v100_v39, %v92_v35 }
  0x27   :  { %v99_v38 = vadd.f32 %v97_v33, %v93_v36  ;;  %v103_v43 = vmul.f32 %v101_v40, %v93_v36 }
  0x29   :  { %v105_v41 = vadd.f32 %v99_v38, %v98_v37  ;;  %v112_v44 = vadd.f32 %v103_v43, %v102_v42 }
  0x2b   :  { %106 = vadd.xlane.f32.xlu0 %v105_v41 }
  0x33   :  { %113 = vadd.xlane.f32.xlu0 %v112_v44 }
  0x9e   :  { %v107_v46 = vpop.xlane.xlu0 %106 }
  0x9f   :  { %v108_v47 = vadd.f32 %v107_v46, %v104_v45 }
  0xa1   :  { %110 = vst.msk [vmem:[#allocation2] sm:$0xff] %vm57_vm0, %v108_v47 }
  0xa6   :  { %v114_v49 = vpop.xlane.xlu0 %113 }
  0xa7   :  { %v115_v50 = vadd.f32 %v114_v49, %v111_v48 }
  0xa8   :  { %v120_v51 = vld [vmem:[#allocation2] sm:$0xff] }
  0xa9   :  { %121 = vst.msk [vmem:[%s240_s2] sm:$0xff] %vm57_vm0, %v120_v51 }
  0xaa   :  { %116 = vst.msk [vmem:[#allocation3] sm:$0xff] %vm57_vm0, %v115_v50 }
  0xb1   :  { %v122_v52 = vld [vmem:[#allocation3] sm:$0xff] }
  0xb2   :  { %123 = vst.msk [vmem:[%s241_s3] sm:$0xff] %vm57_vm0, %v122_v52 }
  0xb3   :  { %132 = vsyncpa [#allocation5], 1 }
  0xb4   :  { %133 = vsyncpa [#allocation7], 1 }

</bundles_post_ra>
